<compile_context>
chip_gen: v6e
topology: v6e:2x2x1
jax: 0.10.0
libtpu: 0.0.40
codegen_flags: <defaults>
</compile_context>

<pallas_src>
import functools

import jax
import jax.numpy as jnp
from jax import lax
from jax.experimental import pallas as pl
from jax.experimental.pallas import tpu as pltpu


def _round_up(x, m):
    return (x + m - 1) // m * m


def _vmem_limit_bytes(per_step_bytes):
    """Generation-aware VMEM limit derived from the actual buffer sizes."""
    try:
        cap = pltpu.get_tpu_info().vmem_capacity_bytes
    except Exception:            # query unavailable -> assume smallest (v7x)
        cap = 64 * 1024 * 1024
    limit = max(int(per_step_bytes * 1.5) + (4 << 20), 32 << 20)
    # <= ~40 MiB on 64 MiB parts (v7x), <= ~96 MiB on 128 MiB parts (v5e/v6e).
    return max(min(limit, int(cap * 0.75), cap - (24 << 20)), 16 << 20)


# --------------------------------------------------------------------------
# Kernels
# --------------------------------------------------------------------------
def _folded_gemm_bn_kernel(p_ref, w_ref, b_ref, o_ref, *, th, wop):
    """One grid step == one (batch, cout-tile, row-tile) output block.

    p_ref: (1, th, wop, Kp)   tap-folded im2col patches, bf16
    w_ref: (Kp, tco)          BN-scale-folded weights, bf16
    b_ref: (1, tco)           folded BN bias, f32
    o_ref: (1, th, wop, tco)  output block, f32
    """
    kp = p_ref.shape[-1]
    tco = o_ref.shape[-1]
    patch = p_ref[0].reshape(th * wop, kp)        # layout no-op (wop % 16 == 0)
    acc = jnp.dot(patch, w_ref[...], preferred_element_type=jnp.float32)
    o_ref[0] = (acc + b_ref[...]).reshape(th, wop, tco).astype(o_ref.dtype)


def _tap_loop_bn_kernel(x_ref, w_ref, b_ref, o_ref, *, kh, kw, dilation, th,
                        wop, cinp):
    """Resident-image tap loop (stride == 1, large Cin).

    x_ref: (1, Hp, Wp, Cinp)   full padded NHWC image, bf16 (resident per b)
    w_ref: (KH*KW, Cinp, tco)  BN-scale-folded weights, bf16
    b_ref: (1, tco)            folded BN bias, f32
    o_ref: (1, th, wop, tco)   output block, f32
    """
    hi = pl.program_id(2)
    row0 = hi * th
    tco = o_ref.shape[-1]

    # Local-value accumulator across the statically unrolled tap loop:
    # tap 0 is a direct assignment, no zero-init / VMEM scratch RMW passes.
    acc = None
    for i in range(kh):
        for j in range(kw):
            patch = x_ref[0, pl.ds(row0 + i * dilation, th),
                          pl.ds(j * dilation, wop), :]
            part = jnp.dot(patch.reshape(th * wop, cinp), w_ref[i * kw + j],
                           preferred_element_type=jnp.float32)
            acc = part if acc is None else acc + part

    o_ref[0] = (acc + b_ref[...]).reshape(th, wop, tco).astype(o_ref.dtype)


# --------------------------------------------------------------------------
# Wrapper
# --------------------------------------------------------------------------
def basic_conv2d(x_nchw, weight_oihw, bn_gamma, bn_beta, bn_mean, bn_var, *,
                 stride=1, padding=0, dilation=1, eps=1e-5):
    """Forward of BasicConv2d: Conv2d(bias=False) -> BatchNorm2d (no ReLU)."""
    n, cin, h, w = x_nchw.shape
    cout, cin_w, kh, kw = weight_oihw.shape
    assert cin == cin_w

    ho = (h + 2 * padding - dilation * (kh - 1) - 1) // stride + 1
    wo = (w + 2 * padding - dilation * (kw - 1) - 1) // stride + 1

    # ---- tiling (MXU-shaped, layout-aligned) ----
    tco = 256 if cout >= 256 else 128        # 256-wide tiles for v6e/v7x MXUs
    cout_p = _round_up(cout, tco)
    n_co = cout_p // tco
    wop = _round_up(wo, 16)                  # bf16 sublane-tile alignment
    th = min(_round_up(ho, 8), max(8, _round_up(512 // wop, 8)))
    ho_p = _round_up(ho, th)
    n_ho = ho_p // th

    # ---- eval-mode BN folding: y = conv(x)*scale + bias, scale into W ----
    scale = bn_gamma / jnp.sqrt(bn_var + eps)                      # (Cout,)
    bias = (bn_beta - bn_mean * scale).astype(jnp.float32)         # (Cout,)
    bias_p = jnp.pad(bias, (0, cout_p - cout)).reshape(1, cout_p)
    w_hwio = (jnp.transpose(weight_oihw, (2, 3, 1, 0))             # (KH,KW,Ci,Co)
              * scale[None, None, None, :]).astype(jnp.bfloat16)

    # Cast BEFORE padding so the (much larger) padded writes are bf16.
    x_nhwc = jnp.transpose(x_nchw, (0, 2, 3, 1)).astype(jnp.bfloat16)

    out_shape = jax.ShapeDtypeStruct((n, ho_p, wop, cout_p), jnp.float32)
    out_spec = pl.BlockSpec((1, th, wop, tco), lambda b, co, hi: (b, hi, 0, co))
    bias_spec = pl.BlockSpec((1, tco), lambda b, co, hi: (0, co))
    # No cross-grid-step reduction -> all axes parallel (megacore-friendly).
    dims = ("parallel", "parallel", "parallel")

    use_folded = (cin <= 32) or (stride > 1)
    if use_folded:
        # ------- tap-folded (im2col over taps) single-GEMM path -------
        kfold = kh * kw * cin
        kp = _round_up(kfold, 128)
        h_need = (ho_p - 1) * stride + dilation * (kh - 1) + 1
        w_need = (wop - 1) * stride + dilation * (kw - 1) + 1
        x_sp = jnp.pad(
            x_nhwc,
            ((0, 0), (padding, max(h_need - h - padding, 0)),
             (padding, max(w_need - w - padding, 0)), (0, 0)))
        taps = []
        for i in range(kh):                 # (kh, kw, cin) ordering == weights
            for j in range(kw):
                r0, c0 = i * dilation, j * dilation
                taps.append(lax.slice(
                    x_sp, (0, r0, c0, 0),
                    (n, r0 + (ho_p - 1) * stride + 1,
                     c0 + (wop - 1) * stride + 1, cin),
                    (1, stride, stride, 1)))
        patches = jnp.concatenate(taps, axis=-1)          # (N, Ho_p, Wop, K)
        patches = jnp.pad(patches, ((0, 0), (0, 0), (0, 0), (0, kp - kfold)))
        w_mat = jnp.pad(w_hwio.reshape(kfold, cout),
                        ((0, kp - kfold), (0, cout_p - cout)))

        vmem_need = (2 * th * wop * kp * 2 + 2 * kp * tco * 2 + 2 * tco * 4
                     + 2 * th * wop * tco * 4 + th * wop * tco * 4)

        out = pl.pallas_call(
            functools.partial(_folded_gemm_bn_kernel, th=th, wop=wop),
            out_shape=out_shape,
            grid_spec=pltpu.PrefetchScalarGridSpec(
                num_scalar_prefetch=0,
                grid=(n, n_co, n_ho),
                in_specs=[
                    pl.BlockSpec((1, th, wop, kp),
                                 lambda b, co, hi: (b, hi, 0, 0)),
                    pl.BlockSpec((kp, tco), lambda b, co, hi: (0, co)),
                    bias_spec,
                ],
                out_specs=out_spec),
            compiler_params=pltpu.CompilerParams(
                dimension_semantics=dims,
                vmem_limit_bytes=_vmem_limit_bytes(vmem_need)),
        )(patches, w_mat, bias_p)
    else:
        # ------- resident-image tap-loop path (stride == 1, large Cin) -------
        cin_p = _round_up(cin, 128)
        hp = max(h + 2 * padding, ho_p + dilation * (kh - 1))
        wp = max(w + 2 * padding, wop + dilation * (kw - 1))
        x_p = jnp.pad(
            x_nhwc,
            ((0, 0), (padding, hp - h - padding),
             (padding, wp - w - padding), (0, cin_p - cin)))
        w_taps = jnp.pad(
            w_hwio, ((0, 0), (0, 0), (0, cin_p - cin), (0, cout_p - cout))
        ).reshape(kh * kw, cin_p, cout_p)

        vmem_need = (2 * hp * wp * cin_p * 2 + 2 * kh * kw * cin_p * tco * 2
                     + 2 * tco * 4 + 2 * th * wop * tco * 4
                     + th * wop * tco * 4)

        out = pl.pallas_call(
            functools.partial(_tap_loop_bn_kernel, kh=kh, kw=kw,
                              dilation=dilation, th=th, wop=wop, cinp=cin_p),
            out_shape=out_shape,
            grid_spec=pltpu.PrefetchScalarGridSpec(
                num_scalar_prefetch=0,
                grid=(n, n_co, n_ho),
                in_specs=[
                    # Full padded image, indexed only by batch -> resident in
                    # VMEM across the inner (cout, row-tile) grid axes.
                    pl.BlockSpec((1, hp, wp, cin_p),
                                 lambda b, co, hi: (b, 0, 0, 0)),
                    pl.BlockSpec((kh * kw, cin_p, tco),
                                 lambda b, co, hi: (0, 0, co)),
                    bias_spec,
                ],
                out_specs=out_spec),
            compiler_params=pltpu.CompilerParams(
                dimension_semantics=dims,
                vmem_limit_bytes=_vmem_limit_bytes(vmem_need)),
        )(x_p, w_taps, bias_p)

    # Strip Ho/Wo/Cout padding, back to NCHW to match the PyTorch convention.
    out = out[:, :ho, :wo, :cout]
    return jnp.transpose(out, (0, 3, 1, 2))


# --------------------------------------------------------------------------
# References & tests
# --------------------------------------------------------------------------
def _reference_f32(x, w_oihw, gamma, beta, mean, var, *,
                   stride, padding, dilation, eps=1e-5):
    """Exact PyTorch-semantics (eval-mode BN) reference in f32."""
    conv = lax.conv_general_dilated(
        x.astype(jnp.float32), w_oihw.astype(jnp.float32),
        window_strides=(stride, stride),
        padding=[(padding, padding), (padding, padding)],
        rhs_dilation=(dilation, dilation),
        dimension_numbers=("NCHW", "OIHW", "NCHW"))
    inv = 1.0 / jnp.sqrt(var + eps)
    return (conv - mean[None, :, None, None]) * (gamma * inv)[None, :, None, None] \
        + beta[None, :, None, None]


def _reference_bf16(x, w_oihw, gamma, beta, mean, var, *,
                    stride, padding, dilation, eps=1e-5):
    """Reference on the same bf16-rounded operands as the kernel."""
    scale = gamma / jnp.sqrt(var + eps)
    bias = beta - mean * scale
    w_folded = (w_oihw * scale[:, None, None, None]).astype(jnp.bfloat16)
    conv = lax.conv_general_dilated(
        x.astype(jnp.bfloat16).astype(jnp.float32),
        w_folded.astype(jnp.float32),
        window_strides=(stride, stride),
        padding=[(padding, padding), (padding, padding)],
        rhs_dilation=(dilation, dilation),
        dimension_numbers=("NCHW", "OIHW", "NCHW"))
    return conv + bias[None, :, None, None]


def _run_case(key, *, n, cin, cout, h, w, k, stride, padding, dilation):
    kx, kw_, kg, kb, km, kv = jax.random.split(key, 6)
    x = jax.random.normal(kx, (n, cin, h, w), dtype=jnp.float32)
    fan_in = cin * k * k
    weight = jax.random.normal(kw_, (cout, cin, k, k),
                               dtype=jnp.float32) / jnp.sqrt(fan_in)
    gamma = 1.0 + 0.1 * jax.random.normal(kg, (cout,), dtype=jnp.float32)
    beta = 0.1 * jax.random.normal(kb, (cout,), dtype=jnp.float32)
    running_mean = 0.05 * jax.random.normal(km, (cout,), dtype=jnp.float32)
    running_var = 1.0 + 0.1 * jnp.abs(
        jax.random.normal(kv, (cout,), dtype=jnp.float32))

    out = basic_conv2d(x, weight, gamma, beta, running_mean, running_var,
                       stride=stride, padding=padding, dilation=dilation)
    out = jax.block_until_ready(out)

    ho = (h + 2 * padding - dilation * (k - 1) - 1) // stride + 1
    wo = (w + 2 * padding - dilation * (k - 1) - 1) // stride + 1
    assert out.shape == (n, cout, ho, wo), out.shape

    ref_b = _reference_bf16(x, weight, gamma, beta, running_mean, running_var,
                            stride=stride, padding=padding, dilation=dilation)
    ref_f = _reference_f32(x, weight, gamma, beta, running_mean, running_var,
                           stride=stride, padding=padding, dilation=dilation)

    # Tight check vs. a reference using the same bf16-rounded operands.
    assert jnp.allclose(out, ref_b, atol=2e-3, rtol=2e-3), \
        float(jnp.max(jnp.abs(out - ref_b)))
    # Loose check vs. the exact f32 module semantics (bf16 rounding budget).
    assert jnp.allclose(out, ref_f, atol=7e-2, rtol=7e-2), \
        float(jnp.max(jnp.abs(out - ref_f)))


if __name__ == "__main__":
    key = jax.random.PRNGKey(0)
    k1, k2, k3, k4 = jax.random.split(key, 4)

    # 1) BasicConv2d(4, 8, 3, padding=1), batch=2, 16x16: small Cin ->
    #    tap-folded single-GEMM path.
    _run_case(k1, n=2, cin=4, cout=8, h=16, w=16, k=3,
              stride=1, padding=1, dilation=1)

    # 2) Dilated conv, Wo not 16-aligned, two Cout tiles (folded path).
    _run_case(k2, n=1, cin=8, cout=160, h=14, w=14, k=3,
              stride=1, padding=2, dilation=2)

    # 3) Large Cin -> resident-image tap-loop path (local-value accumulator).
    _run_case(k3, n=1, cin=64, cout=96, h=16, w=16, k=3,
              stride=1, padding=1, dilation=1)

    # 4) Strided conv, odd spatial size: stride handled in the wrapper im2col
    #    (no strided sublane loads inside the kernel).
    _run_case(k4, n=1, cin=3, cout=16, h=17, w=17, k=3,
              stride=2, padding=1, dilation=1)

    print("KERNEL_OK")
</pallas_src>

<mosaic_0001>
module attributes {stable_mosaic.version = 11 : i64} {
  func.func @_folded_gemm_bn_kernel(%arg0: i32, %arg1: i32, %arg2: i32, %arg3: memref<1x16x16x128xbf16, #tpu.memory_space<vmem>>, %arg4: memref<128x128xbf16, #tpu.memory_space<vmem>>, %arg5: memref<1x128xf32, #tpu.memory_space<vmem>>, %arg6: memref<1x16x16x128xf32, #tpu.memory_space<vmem>>) attributes {dimension_semantics = [#tpu.dimension_semantics<parallel>, #tpu.dimension_semantics<parallel>, #tpu.dimension_semantics<parallel>], iteration_bounds = array<i64: 2, 1, 1>, scalar_prefetch = 0 : i64, scratch_operands = 0 : i64, tpu.core_type = #tpu.core_type<tc>, window_params = [{transform_indices = @transform_0, window_bounds = array<i64: 1, 16, 16, 128>}, {transform_indices = @transform_1, window_bounds = array<i64: 128, 128>}, {transform_indices = @transform_2, window_bounds = array<i64: 1, 128>}, {transform_indices = @transform_3, window_bounds = array<i64: 1, 16, 16, 128>}]} {
    %c0 = arith.constant 0 : index
    %c0_0 = arith.constant 0 : index
    %c0_1 = arith.constant 0 : index
    %c0_2 = arith.constant 0 : index
    %0 = vector.load %arg3[%c0, %c0_0, %c0_1, %c0_2] : memref<1x16x16x128xbf16, #tpu.memory_space<vmem>>, vector<1x16x16x128xbf16>
    %1 = vector.shape_cast %0 : vector<1x16x16x128xbf16> to vector<16x16x128xbf16>
    %2 = vector.shape_cast %1 : vector<16x16x128xbf16> to vector<256x128xbf16>
    %c0_3 = arith.constant 0 : index
    %c0_4 = arith.constant 0 : index
    %3 = vector.load %arg4[%c0_3, %c0_4] : memref<128x128xbf16, #tpu.memory_space<vmem>>, vector<128x128xbf16>
    %cst = arith.constant dense<0.000000e+00> : vector<256x128xf32>
    %4 = tpu.matmul %2, %3, %cst {dimension_numbers = #tpu.dot_dimension_numbers<[1], [0], [0], [1], [0, 0, 1, 1], [], []>} : vector<256x128xbf16>, vector<128x128xbf16>, vector<256x128xf32> -> vector<256x128xf32>
    %c0_5 = arith.constant 0 : index
    %c0_6 = arith.constant 0 : index
    %5 = vector.load %arg5[%c0_5, %c0_6] : memref<1x128xf32, #tpu.memory_space<vmem>>, vector<1x128xf32>
    %6 = vector.broadcast %5 : vector<1x128xf32> to vector<256x128xf32>
    %7 = arith.addf %4, %6 : vector<256x128xf32>
    %8 = vector.shape_cast %7 : vector<256x128xf32> to vector<16x16x128xf32>
    %c0_7 = arith.constant 0 : index
    %c0_8 = arith.constant 0 : index
    %c0_9 = arith.constant 0 : index
    %c0_10 = arith.constant 0 : index
    %9 = vector.load %arg6[%c0_7, %c0_8, %c0_9, %c0_10] : memref<1x16x16x128xf32, #tpu.memory_space<vmem>>, vector<1x16x16x128xf32>
    %10 = vector.shape_cast %9 : vector<1x16x16x128xf32> to vector<16x16x128xf32>
    %11 = vector.shape_cast %8 : vector<16x16x128xf32> to vector<1x16x16x128xf32>
    tpu.vector_store %arg6[%c0_7, %c0_8, %c0_9, %c0_10], %11 {strides = array<i32>} : memref<1x16x16x128xf32, #tpu.memory_space<vmem>>, vector<1x16x16x128xf32>,
    return
  }
  func.func @transform_0(%arg0: i32, %arg1: i32, %arg2: i32) -> (i32, i32, i32, i32) {
    %c0_i32 = arith.constant 0 : i32
    %c0_i32_0 = arith.constant 0 : i32
    %c0_i32_1 = arith.constant 0 : i32
    return %arg0, %arg2, %c0_i32, %c0_i32_0 : i32, i32, i32, i32
  }
  func.func @transform_1(%arg0: i32, %arg1: i32, %arg2: i32) -> (i32, i32) {
    %c0_i32 = arith.constant 0 : i32
    %c0_i32_0 = arith.constant 0 : i32
    return %c0_i32, %arg1 : i32, i32
  }
  func.func @transform_2(%arg0: i32, %arg1: i32, %arg2: i32) -> (i32, i32) {
    %c0_i32 = arith.constant 0 : i32
    %c0_i32_0 = arith.constant 0 : i32
    return %c0_i32, %arg1 : i32, i32
  }
  func.func @transform_3(%arg0: i32, %arg1: i32, %arg2: i32) -> (i32, i32, i32, i32) {
    %c0_i32 = arith.constant 0 : i32
    %c0_i32_0 = arith.constant 0 : i32
    return %arg0, %arg2, %c0_i32, %arg1 : i32, i32, i32, i32
  }
}

</mosaic_0001>

<bundles_post_ra>
// kernel: tpu_custom_call.1
= control target key start
LH: loop header
LB: loop body
LE: loop exit
PB: predicated region body
PF: predicated region fallthrough
CT: control target
= control target key end

     0   :  { %8 = vsyncpa [#allocation3], 0  ;;  %s1460_s0 = inlined_call_operand.hbm [shape: bf16[2,16,16,128], index: 0, kind: input, shape index: {}]   ;;  %s1461_s1 = inlined_call_operand.hbm [shape: bf16[128,128], index: 1, kind: input, shape index: {}]   ;;  %s1462_s2 = inlined_call_operand.vmem [shape: f32[1,128], index: 2, kind: input, shape index: {}]   ;;  %s1463_s3 = inlined_call_operand.hbm [shape: f32[2,16,16,128], index: 3, kind: output, shape index: {}]  }
   0x1   :  { %10 = vsyncpa [#allocation3 + $0x1], 0 }
   0x2   :  { %11 = vsyncpa [#allocation6], 0 }
   0x3   :  { %12 = vsyncpa [#allocation4], 0 }
   0x4   :  { %14 = vsyncpa [#allocation4 + $0x1], 0  ;;  %s1182_s12 = smov 0   ;;  %s1184_s13 = smov 0  }
   0x5   :  { %s1186_s14 = smov 0   ;;  %s1188_s15 = smov 0  }
   0x6   :  { %s1190_s16 = smov 0   ;;  %s1192_s17 = smov 0  }
   0x7 LB: > { %s781_s18 = sadd.s32 4294967295, %s1153_s17   ;;  %s782_s19 = sadd.s32 4294967294, %s1153_s17   ;;  %s1153_s17 = sphi %s1192_s17, %s20_s17   ;;  %s1149_s16 = sphi %s1190_s16, %s1485_s16   ;;  %s1145_s15 = sphi %s1188_s15, %s1484_s15   ;;  %s1141_s14 = sphi %s1186_s14, %s1483_s14   ;;  %s1137_s13 = sphi %s1184_s13, %s1482_s13   ;;  %s1133_s12 = sphi %s1182_s12, %s1481_s12  }
   0x8   : > { %p61_p0 = scmp.ne.s32.totalorder %s1137_s13, %s1133_s12  ;;  %p1216_p1 = scmp.eq.s32.totalorder %s781_s18, 0 }
   0x9   : > { %p1220_p2 = scmp.eq.s32.totalorder %s781_s18, 1  ;;  %p147_p3 = scmp.eq.s32.totalorder %s782_s19, 1 }
   0xa   : > { %p1226_p4 = por %p1216_p1, %p61_p0  ;;  %p783_p5 = scmp.ge.s32.totalorder %s1153_s17, 1 }
   0xb   : > { %p1231_p6 = por %p147_p3, %p61_p0  ;;  %p154_p7 = scmp.lt.s32.totalorder %s1153_s17, 3 }
   0xc   : > { %s1469_s22 = scalar_select %p1226_p4, 1, 0 }
   0xd   : > { %s1470_s23 = scalar_select %p1231_p6, 1, 0 }
   0xe   : > { %p1236_p8 = pnand %p783_p5, %p154_p7  ;;  %s1155_s25 = smov [#allocation5]  }
   0xf   : > { %s168_s26 = sshll.u32 %s1155_s25, 4  ;;  %s39_s28 = sadd.s32 1, %s1149_s16  ;;  %s169_s26 = int_to_ptr.vmem [resolvable:$true] %s168_s26 }
  0x10   : > { %p922_p9 = pneg %p1236_p8  ;;  %s1026_s29 = scalar_lea.vmem %s169_s26, 1024 }
  0x11   : > { %p1027_p13 = scmp.ne.s32.totalorder %s169_s26, %s1026_s29  ;;  %p1034_p5 = scmp.lt.s32.totalorder %s169_s26, %s169_s26 }
  0x12   : > { %p1245_p11 = pnand %p922_p9, %p1216_p1  ;;  %p1035_p7 = scmp.lt.s32.totalorder %s1026_s29, %s1026_s29 }
  0x14   : > { %p1017_p12 = pneg %p1245_p11  ;;  %p1036_p6 = por %p1035_p7, %p1034_p5 }
  0x16   : > { %p1029_p0 = pnand %p1027_p13, %p1017_p12 }
  0x18   : > { %p1030_p3 = pneg %p1029_p0 }
  0x1a   : > { %p1037_p4 = pnand %p1036_p6, %p1030_p3 }
  0x1c   : > { %1040 = shalt.err (!%p1037_p4)
}
  0x1d   : > { %s1465_s30 = smov 64   ;;  %s1466_s4 = smov 4  }
  0x1e   : > { %925 = dma.hbm_to_vmem [thread:$0]  (!%p1245_p11), %s1461_s1, 1024, %s169_s26, [#allocation6], %s1465_s30, %s1465_s30, %s1466_s4  }
  0x1f   : > { %p41_p4 = scmp.ge.s32.totalorder %s39_s28, 2  ;;  %s48_s7 = sadd.s32 1, %s1141_s14 }
  0x20   : > { %p55_p6 = scmp.ne.s32.totalorder %s1141_s14, %s1137_s13  ;;  %p56_p9 = scmp.eq.s32.totalorder %s1153_s17, 0 }
  0x21   : > { %s1487_s28 = smov (%p41_p4, %s39_s28), 0  ;;  %p935_p0 = scmp.lt.s32.totalorder %s1153_s17, 2 }
  0x22   : > { %p1266_p12 = por %p56_p9, %p55_p6  ;;  %p1272_p13 = por %p1220_p2, %p55_p6 }
  0x23   : > { %s43_s10 = ssub.s32 %s1149_s16, %s1487_s28  ;;  %s188_s11 = sand.u32 1, %s1141_s14  }
  0x24   : > { %p46_p11 = scmp.eq.s32.totalorder %s43_s10, 0  ;;  %s787_s18 = sshll.u32 %s188_s11, 7 }
  0x25   : > { %s824_s25 = sshll.u32 %s1149_s16, 11  ;;  %s192_s5 = scalar_lea.vmem [#allocation2], %s787_s18 }
  0x26   : > { %s1281_s19 = scalar_select %p46_p11, %s1141_s14, %s48_s7  }
  0x27   : > { %s201_s29 = scalar_lea.hbm %s1460_s0, %s824_s25  ;;  %s202_s6 = sshll.u32 %s192_s5, 4  ;;  %s203_s6 = int_to_ptr.vmem [resolvable:$true] %s202_s6 }
  0x28   : > { %p1289_p2 = pnand %p935_p0, %p1266_p12  ;;  %s189_s30 = scalar_lea.sflag [#allocation3], %s188_s11 }
  0x29   : > { %s1054_s10 = scalar_lea.vmem %s203_s6, 2048  ;;  %s1158_s7 = smov [#allocation2]  }
  0x2a   : > { %p1043_p3 = pneg %p1289_p2  ;;  %p1055_p5 = scmp.ne.s32.totalorder %s203_s6, %s1054_s10 }
  0x2b   : > { %s1059_s4 = sshll.u32 %s1158_s7, 4  ;;  %s1060_s4 = int_to_ptr.vmem [resolvable:$false] %s1059_s4 }
  0x2c   : > { %p1057_p7 = pnand %p1055_p5, %p1043_p3  ;;  %s1061_s25 = scalar_lea.vmem %s1060_s4, 4096 }
  0x2d   : > { %p1062_p6 = scmp.lt.s32.totalorder %s203_s6, %s1060_s4  ;;  %p1063_p9 = scmp.lt.s32.totalorder %s1061_s25, %s1054_s10 }
  0x2e   : > { %p1058_p4 = pneg %p1057_p7 }
  0x2f   : > { %p1064_p11 = por %p1063_p9, %p1062_p6 }
  0x31   : > { %p1065_p10 = pnand %p1064_p11, %p1058_p4 }
  0x33   : > { %1068 = shalt.err (!%p1065_p10)
}
  0x34   : > { %s1476_s8 = smov 4   ;;  %s1477_s18 = smov 64  }
  0x35   : > { %929 = dma.hbm_to_vmem [thread:$0]  (!%p1289_p2), %s201_s29, 2048, %s203_s6, %s189_s30, %s1477_s18, %s1477_s18, %s1476_s8  }
  0x36   : > { %214 = sbr.rel (%p1236_p8) target bundleno = 334 (0x14e), region = 32  ;;  %s1303_s11 = sand.u32 (!%p1236_p8), 1, %s1137_s13  }
  0x37   : > { %s791_s4 = sshll.u32 (!%p1236_p8), %s1303_s11, 7  ;;  %s217_s26 = scalar_lea.sflag (!%p1236_p8), [#allocation3], %s1303_s11 }
  0x38   : > { %s1307_s27 = scalar_lea.vmem (!%p1236_p8), [#allocation2], %s791_s4  ;;  %p1478_p10 = scmp.ne.s32.totalorder (!%p1236_p8), %s1469_s22, 0 }
  0x3b   : > { %1120 = dma.done.wait (%p1478_p10), %s217_s26, 2048  }
  0x3c   : > { %1122 = vsyncadd (%p1478_p10), %s217_s26, 4294965248 }
  0x3d   : > { %1124 = dma.done.wait (%p1216_p1), [#allocation6], 1024  }
  0x3e   : > { %1126 = vsyncadd (%p1216_p1), [#allocation6], 4294966272  ;;  %v991_v0 = vld [vmem:[#allocation5 + $0x38] sm:$0xff]   ;;  %v992_v1 = vld [vmem:[#allocation5 + $0x30] sm:$0xff]   ;;  %s793_s20 = sshll.u32 %s1303_s11, 8  ;;  %s825_s29 = sshll.u32 %s1145_s15, 12 }
  0x3f   : > { %850 = vmatprep.subr.bf16.mxu0 %v991_v0  ;;  %898 = vmatprep.subr.bf16.mxu1 %v991_v0  ;;  %v993_v2 = vld [vmem:[#allocation5 + $0x28] sm:$0xff]   ;;  %v994_v3 = vld [vmem:[#allocation5 + $0x20] sm:$0xff]   ;;  %v995_v6 = vld [vmem:[#allocation5 + $0x18] sm:$0xff]   ;;  %s1341_s30 = scalar_lea.vmem [#allocation7], %s793_s20  ;;  %s1404_s10 = scalar_lea.hbm %s1463_s3, %s825_s29 }
  0x40   : > { %851 = vmatpush3.bf16.msra.mxu0 %v991_v0  ;;  %906 = vmatpush3.bf16.msra.mxu1 %v991_v0  ;;  %v999_v4 = vld [vmem:[%s1307_s27] sm:$0xff]   ;;  %v996_v7 = vld [vmem:[#allocation5 + $0x10] sm:$0xff]   ;;  %v997_v8 = vld [vmem:[#allocation5 + $0x8] sm:$0xff]   ;;  %s666_s5 = sshll.u32 %s1341_s30, 4  ;;  %s649_s15 = scalar_lea.sflag [#allocation4], %s1303_s11  ;;  %s1406_s5 = int_to_ptr.vmem [resolvable:$true] %s666_s5 }
  0x41   : > { %852 = vmatprep.subr.bf16.mxu0 %v992_v1  ;;  %899 = vmatprep.subr.bf16.mxu1 %v992_v1  ;;  %v1000_v5 = vld [vmem:[%s1307_s27 + $0x40] sm:$0xff]   ;;  %v1001_v10 = vld [vmem:[%s1307_s27 + $0x8] sm:$0xff]   ;;  %v1003_v12 = vld [vmem:[%s1307_s27 + $0x10] sm:$0xff]   ;;  %s1069_s7 = scalar_lea.vmem %s1406_s5, 4096  ;;  %s1159_s25 = smov [#allocation7]  }
  0x42   : > { %866 = vmatprep.mubr.bf16.mxu0 %v999_v4  ;;  %882 = vmatprep.mubr.bf16.mxu1 %v1000_v5  ;;  %v998_v9 = vld [vmem:[#allocation5] sm:$0xff]   ;;  %v1002_v11 = vld [vmem:[%s1307_s27 + $0x48] sm:$0xff]   ;;  %v1004_v13 = vld [vmem:[%s1307_s27 + $0x50] sm:$0xff]   ;;  %p1070_p1 = scmp.ne.s32.totalorder %s1406_s5, %s1069_s7  ;;  %s1073_s8 = sshll.u32 %s1159_s25, 4  ;;  %s1074_s8 = int_to_ptr.vmem [resolvable:$false] %s1073_s8 }
  0x43   : > { %v1005_v14 = vld [vmem:[%s1307_s27 + $0x18] sm:$0xff]   ;;  %v1007_v16 = vld [vmem:[%s1307_s27 + $0x20] sm:$0xff]   ;;  %v1009_v18 = vld [vmem:[%s1307_s27 + $0x28] sm:$0xff]   ;;  %s1075_s18 = scalar_lea.vmem %s1074_s8, 8192  ;;  %p1076_p0 = scmp.lt.s32.totalorder %s1406_s5, %s1074_s8 }
  0x44   : > { %853 = vmatpush3.bf16.msra.mxu0 %v992_v1  ;;  %907 = vmatpush3.bf16.msra.mxu1 %v992_v1  ;;  %v1006_v15 = vld [vmem:[%s1307_s27 + $0x58] sm:$0xff]   ;;  %v1008_v17 = vld [vmem:[%s1307_s27 + $0x60] sm:$0xff]   ;;  %v1010_v19 = vld [vmem:[%s1307_s27 + $0x68] sm:$0xff]   ;;  %p1071_p8 = pnand %p1070_p1, %p1272_p13  ;;  %p1077_p2 = scmp.lt.s32.totalorder %s1075_s18, %s1069_s7 }
  0x45   : > { %854 = vmatprep.subr.bf16.mxu0 %v993_v2  ;;  %900 = vmatprep.subr.bf16.mxu1 %v993_v2  ;;  %v1011_v20 = vld [vmem:[%s1307_s27 + $0x30] sm:$0xff]   ;;  %v1013_v22 = vld [vmem:[%s1307_s27 + $0x38] sm:$0xff]   ;;  %v1337_v24 = vld [vmem:[%s1462_s2] ss:$0 sm:$0xff] }
  0x46   : > { %v1012_v21 = vld [vmem:[%s1307_s27 + $0x70] sm:$0xff]   ;;  %v1014_v23 = vld [vmem:[%s1307_s27 + $0x78] sm:$0xff]   ;;  %p1072_p12 = pneg %p1071_p8  ;;  %p1078_p3 = por %p1077_p2, %p1076_p0 }
  0x48   : > { %855 = vmatpush3.bf16.msra.mxu0 %v993_v2  ;;  %908 = vmatpush3.bf16.msra.mxu1 %v993_v2  ;;  %p1079_p5 = pnand %p1078_p3, %p1072_p12 }
  0x49   : > { %856 = vmatprep.subr.bf16.mxu0 %v994_v3  ;;  %901 = vmatprep.subr.bf16.mxu1 %v994_v3 }
  0x4c   : > { %857 = vmatpush3.bf16.msra.mxu0 %v994_v3  ;;  %909 = vmatpush3.bf16.msra.mxu1 %v994_v3 }
  0x4d   : > { %858 = vmatprep.subr.bf16.mxu0 %v995_v6  ;;  %902 = vmatprep.subr.bf16.mxu1 %v995_v6 }
  0x50   : > { %859 = vmatpush3.bf16.msra.mxu0 %v995_v6  ;;  %910 = vmatpush3.bf16.msra.mxu1 %v995_v6 }
  0x51   : > { %860 = vmatprep.subr.bf16.mxu0 %v996_v7  ;;  %903 = vmatprep.subr.bf16.mxu1 %v996_v7 }
  0x54   : > { %861 = vmatpush3.bf16.msra.mxu0 %v996_v7  ;;  %911 = vmatpush3.bf16.msra.mxu1 %v996_v7 }
  0x55   : > { %862 = vmatprep.subr.bf16.mxu0 %v997_v8  ;;  %904 = vmatprep.subr.bf16.mxu1 %v997_v8 }
  0x58   : > { %863 = vmatpush3.bf16.msra.mxu0 %v997_v8  ;;  %912 = vmatpush3.bf16.msra.mxu1 %v997_v8 }
  0x59   : > { %864 = vmatprep.subr.bf16.mxu0 %v998_v9  ;;  %905 = vmatprep.subr.bf16.mxu1 %v998_v9 }
  0x5c   : > { %865 = vmatpush3.bf16.msra.mxu0 %v998_v9  ;;  %913 = vmatpush3.bf16.msra.mxu1 %v998_v9 }
  0x5f   : > { %867 = vmatmul.mubr.bf16.vlgmr.msra.gmra.mxu0 %v1001_v10  ;;  %883 = vmatmul.mubr.bf16.vlgmr.msra.gmra.mxu1 %v1002_v11 }
  0x60   : > { %870 = vmatprep.mubr.bf16.mxu0 %v1003_v12  ;;  %886 = vmatprep.mubr.bf16.mxu1 %v1004_v13 }
  0x67   : > { %871 = vmatmul.mubr.bf16.gmra.mxu0 %v1005_v14  ;;  %887 = vmatmul.mubr.bf16.gmra.mxu1 %v1006_v15 }
  0x68   : > { %874 = vmatprep.mubr.bf16.mxu0 %v1007_v16  ;;  %890 = vmatprep.mubr.bf16.mxu1 %v1008_v17 }
  0x6f   : > { %875 = vmatmul.mubr.bf16.gmra.mxu0 %v1009_v18  ;;  %891 = vmatmul.mubr.bf16.gmra.mxu1 %v1010_v19 }
  0x70   : > { %878 = vmatprep.mubr.bf16.mxu0 %v1011_v20  ;;  %894 = vmatprep.mubr.bf16.mxu1 %v1012_v21 }
  0x77   : > { %879 = vmatmul.mubr.bf16.gmra.mxu0 %v1013_v22  ;;  %895 = vmatmul.mubr.bf16.gmra.mxu1 %v1014_v23 }
 0x11f   : > { %v868_v25 = vpop.f32.mrf.mxu0  ;;  %v884_v26 = vpop.f32.mrf.mxu1 }
 0x120   : > { %v498_v27 = vadd.f32 %v868_v25, %v1337_v24  ;;  %v562_v28 = vadd.f32 %v884_v26, %v1337_v24 }
 0x121   : > { %v489_v29 = vpop.f32.mrf.mxu0  ;;  %v553_v30 = vpop.f32.mrf.mxu1 }
 0x122   : > { %618 = vst [vmem:[%s1341_s30 + $0x10] sm:$0xff] %v498_v27  ;;  %634 = vst [vmem:[%s1341_s30 + $0x90] sm:$0xff] %v562_v28  ;;  %v490_v31 = vadd.f32 %v1337_v24, %v489_v29  ;;  %v554_v32 = vadd.f32 %v1337_v24, %v553_v30 }
 0x123   : > { %v869_v33 = vpop.f32.mrf.mxu0  ;;  %v885_v34 = vpop.f32.mrf.mxu1 }
 0x124   : > { %616 = vst [vmem:[%s1341_s30] sm:$0xff] %v490_v31  ;;  %632 = vst [vmem:[%s1341_s30 + $0x80] sm:$0xff] %v554_v32  ;;  %v501_v35 = vadd.f32 %v869_v33, %v1337_v24  ;;  %v565_v36 = vadd.f32 %v885_v34, %v1337_v24 }
 0x125   : > { %v492_v37 = vpop.f32.mrf.mxu0  ;;  %v556_v38 = vpop.f32.mrf.mxu1 }
 0x126   : > { %619 = vst [vmem:[%s1341_s30 + $0x18] sm:$0xff] %v501_v35  ;;  %635 = vst [vmem:[%s1341_s30 + $0x98] sm:$0xff] %v565_v36  ;;  %v493_v39 = vadd.f32 %v1337_v24, %v492_v37  ;;  %v557_v40 = vadd.f32 %v1337_v24, %v556_v38 }
 0x127   : > { %v872_v41 = vpop.f32.mrf.mxu0  ;;  %v888_v42 = vpop.f32.mrf.mxu1 }
 0x128   : > { %617 = vst [vmem:[%s1341_s30 + $0x8] sm:$0xff] %v493_v39  ;;  %633 = vst [vmem:[%s1341_s30 + $0x88] sm:$0xff] %v557_v40  ;;  %v514_v43 = vadd.f32 %v872_v41, %v1337_v24  ;;  %v578_v44 = vadd.f32 %v888_v42, %v1337_v24 }
 0x129   : > { %v505_v45 = vpop.f32.mrf.mxu0  ;;  %v569_v46 = vpop.f32.mrf.mxu1 }
 0x12a   : > { %622 = vst [vmem:[%s1341_s30 + $0x30] sm:$0xff] %v514_v43  ;;  %638 = vst [vmem:[%s1341_s30 + $0xb0] sm:$0xff] %v578_v44  ;;  %v506_v47 = vadd.f32 %v1337_v24, %v505_v45  ;;  %v570_v48 = vadd.f32 %v1337_v24, %v569_v46 }
 0x12b   : > { %v873_v49 = vpop.f32.mrf.mxu0  ;;  %v889_v50 = vpop.f32.mrf.mxu1 }
 0x12c   : > { %620 = vst [vmem:[%s1341_s30 + $0x20] sm:$0xff] %v506_v47  ;;  %636 = vst [vmem:[%s1341_s30 + $0xa0] sm:$0xff] %v570_v48  ;;  %v517_v51 = vadd.f32 %v873_v49, %v1337_v24  ;;  %v581_v52 = vadd.f32 %v889_v50, %v1337_v24 }
 0x12d   : > { %v508_v53 = vpop.f32.mrf.mxu0  ;;  %v572_v54 = vpop.f32.mrf.mxu1 }
 0x12e   : > { %623 = vst [vmem:[%s1341_s30 + $0x38] sm:$0xff] %v517_v51  ;;  %639 = vst [vmem:[%s1341_s30 + $0xb8] sm:$0xff] %v581_v52  ;;  %v509_v55 = vadd.f32 %v1337_v24, %v508_v53  ;;  %v573_v56 = vadd.f32 %v1337_v24, %v572_v54 }
 0x12f   : > { %v876_v57 = vpop.f32.mrf.mxu0  ;;  %v892_v58 = vpop.f32.mrf.mxu1 }
 0x130   : > { %621 = vst [vmem:[%s1341_s30 + $0x28] sm:$0xff] %v509_v55  ;;  %637 = vst [vmem:[%s1341_s30 + $0xa8] sm:$0xff] %v573_v56  ;;  %v530_v59 = vadd.f32 %v876_v57, %v1337_v24  ;;  %v594_v60 = vadd.f32 %v892_v58, %v1337_v24 }
 0x131   : > { %v521_v61 = vpop.f32.mrf.mxu0  ;;  %v585_v62 = vpop.f32.mrf.mxu1 }
 0x132   : > { %626 = vst [vmem:[%s1341_s30 + $0x50] sm:$0xff] %v530_v59  ;;  %642 = vst [vmem:[%s1341_s30 + $0xd0] sm:$0xff] %v594_v60  ;;  %v522_v63 = vadd.f32 %v1337_v24, %v521_v61  ;;  %v586_v0 = vadd.f32 %v1337_v24, %v585_v62 }
 0x133   : > { %v877_v1 = vpop.f32.mrf.mxu0  ;;  %v893_v2 = vpop.f32.mrf.mxu1 }
 0x134   : > { %624 = vst [vmem:[%s1341_s30 + $0x40] sm:$0xff] %v522_v63  ;;  %640 = vst [vmem:[%s1341_s30 + $0xc0] sm:$0xff] %v586_v0  ;;  %v533_v3 = vadd.f32 %v877_v1, %v1337_v24  ;;  %v597_v4 = vadd.f32 %v893_v2, %v1337_v24 }
 0x135   : > { %v524_v5 = vpop.f32.mrf.mxu0  ;;  %v588_v6 = vpop.f32.mrf.mxu1 }
 0x136   : > { %627 = vst [vmem:[%s1341_s30 + $0x58] sm:$0xff] %v533_v3  ;;  %643 = vst [vmem:[%s1341_s30 + $0xd8] sm:$0xff] %v597_v4  ;;  %v525_v7 = vadd.f32 %v1337_v24, %v524_v5  ;;  %v589_v8 = vadd.f32 %v1337_v24, %v588_v6 }
 0x137   : > { %v880_v9 = vpop.f32.mrf.mxu0  ;;  %v896_v10 = vpop.f32.mrf.mxu1 }
 0x138   : > { %625 = vst [vmem:[%s1341_s30 + $0x48] sm:$0xff] %v525_v7  ;;  %641 = vst [vmem:[%s1341_s30 + $0xc8] sm:$0xff] %v589_v8  ;;  %v546_v11 = vadd.f32 %v880_v9, %v1337_v24  ;;  %v610_v12 = vadd.f32 %v896_v10, %v1337_v24 }
 0x139   : > { %v537_v13 = vpop.f32.mrf.mxu0  ;;  %v601_v14 = vpop.f32.mrf.mxu1 }
 0x13a   : > { %630 = vst [vmem:[%s1341_s30 + $0x70] sm:$0xff] %v546_v11  ;;  %646 = vst [vmem:[%s1341_s30 + $0xf0] sm:$0xff] %v610_v12  ;;  %v538_v15 = vadd.f32 %v1337_v24, %v537_v13  ;;  %v602_v16 = vadd.f32 %v1337_v24, %v601_v14 }
 0x13b   : > { %v881_v17 = vpop.f32.mrf.mxu0  ;;  %v897_v18 = vpop.f32.mrf.mxu1 }
 0x13c   : > { %628 = vst [vmem:[%s1341_s30 + $0x60] sm:$0xff] %v538_v15  ;;  %644 = vst [vmem:[%s1341_s30 + $0xe0] sm:$0xff] %v602_v16  ;;  %v549_v19 = vadd.f32 %v881_v17, %v1337_v24  ;;  %v613_v20 = vadd.f32 %v897_v18, %v1337_v24 }
 0x13d   : > { %v540_v21 = vpop.f32.mrf.mxu0  ;;  %v604_v22 = vpop.f32.mrf.mxu1 }
 0x13e   : > { %631 = vst [vmem:[%s1341_s30 + $0x78] sm:$0xff] %v549_v19  ;;  %647 = vst [vmem:[%s1341_s30 + $0xf8] sm:$0xff] %v613_v20  ;;  %v541_v23 = vadd.f32 %v1337_v24, %v540_v21  ;;  %v605_v25 = vadd.f32 %v1337_v24, %v604_v22 }
 0x140   : > { %629 = vst [vmem:[%s1341_s30 + $0x68] sm:$0xff] %v541_v23  ;;  %645 = vst [vmem:[%s1341_s30 + $0xe8] sm:$0xff] %v605_v25 }
 0x141   : > { %1082 = shalt.err (!%p1079_p5)
}
 0x142   : > { %s1083_s4 = scalar_lea.hbm %s1404_s10, 4096  ;;  %s1087_s20 = scalar_lea.hbm %s1463_s3, 8192 }
 0x143   : > { %p1084_p7 = scmp.ne.s32.totalorder %s1404_s10, %s1083_s4  ;;  %p1088_p9 = scmp.lt.s32.totalorder %s1404_s10, %s1463_s3 }
 0x144   : > { %p1089_p11 = scmp.lt.s32.totalorder %s1087_s20, %s1083_s4 }
 0x145   : > { %p1085_p4 = pnand %p1084_p7, %p1272_p13 }
 0x146   : > { %p1090_p10 = por %p1089_p11, %p1088_p9 }
 0x147   : > { %p1086_p6 = pneg %p1085_p4 }
 0x149   : > { %p1091_p1 = pnand %p1090_p10, %p1086_p6 }
 0x14b   : > { %1094 = shalt.err (!%p1091_p1)
}
 0x14c   : > { %s1160_s30 = smov 128   ;;  %s1161_s29 = smov 8  }
 0x14d   : > { %920 = dma.vmem_to_hbm [thread:$0]  (%p1272_p13), %s1406_s5, 4096, %s1404_s10, %s649_s15, %s1160_s30, %s1160_s30, %s1161_s29  }
 0x14e PF: > { %s681_s6 = sand.u32 1, %s1133_s12   ;;  %p1479_p8 = scmp.ne.s32.totalorder %s1470_s23, 0 }
 0x14f   : > { %p1480_p12 = scmp.ge.s32.totalorder %s1153_s17, 2  ;;  %s682_s21 = scalar_lea.sflag [#allocation4], %s681_s6 }
 0x151   : > { %p931_p0 = pnand %p1480_p12, %p1479_p8 }
 0x153   : > { %p932_p2 = pneg %p931_p0 }
 0x155   : > { %1128 = dma.done.wait (%p932_p2), %s682_s21, 4096  }
 0x156   : > { %1130 = vsyncadd (%p932_p2), %s682_s21, 4294963200  ;;  %s20_s17 = sadd.s32 1, %s1153_s17   ;;  %s1481_s12 = smov %s1137_s13 }
 0x157   : > { %p17_p3 = scmp.ge.s32.totalorder %s20_s17, 4   ;;  %s1482_s13 = smov %s1141_s14 }
 0x158   : > { %s1483_s14 = smov %s1281_s19  ;;  %s1484_s15 = smov %s1149_s16 }
 0x159   : > { %s1485_s16 = smov %s1487_s28  ;;  %19 = sbr.rel (!%p17_p3) target bundleno = 7 (0x7), region = 85 }
 0x15e   :  { %687 = vsyncpa [#allocation3], 1 }
 0x15f   :  { %689 = vsyncpa [#allocation3 + $0x1], 1 }
 0x160   :  { %690 = vsyncpa [#allocation6], 1 }
 0x161   :  { %691 = vsyncpa [#allocation4], 1 }
 0x162   :  { %693 = vsyncpa [#allocation4 + $0x1], 1 }

</bundles_post_ra>
